<compile_context>
chip_gen: v5e
topology: v5e:2x2
jax: 0.10.0
libtpu: 0.0.40
codegen_flags: <defaults>
</compile_context>

<pallas_src>
import numpy as np
import jax
import jax.numpy as jnp
from jax.experimental import pallas as pl
from jax.experimental.pallas import tpu as pltpu


def _round_up(x, m):
    return ((x + m - 1) // m) * m


# ---------------------------------------------------------------------------
# 1) Literal spec: linear.forward(x) = x  (identity passthrough).
# ---------------------------------------------------------------------------
def _identity_kernel(x_ref, o_ref):
    o_ref[...] = x_ref[...]


def linear_forward(x):
    """Pallas identity kernel matching the literal `linear` nn.Module forward."""
    return pl.pallas_call(
        _identity_kernel,
        out_shape=jax.ShapeDtypeStruct(x.shape, x.dtype),
    )(x)


# ---------------------------------------------------------------------------
# 2) Fully-connected forward (semantics validated by the prior reviews).
# ---------------------------------------------------------------------------
def _fc_kernel_factory(activation, weight_gain, has_bias):
    """Kernel with the scalar gain / activation baked in statically."""

    def _epilogue(acc, b=None):
        acc = acc * jnp.float32(weight_gain)
        if b is not None:
            acc = acc + b  # bias_gain already folded into b on the host
        if activation == "relu":
            acc = jnp.maximum(acc, 0.0)
        elif activation == "linear":
            pass
        else:
            # TODO(synk): other activations from get_activation (gelu/selu/...) not wired up.
            raise NotImplementedError(activation)
        return acc

    if has_bias:
        def kernel(x_ref, w_ref, b_ref, o_ref, acc_ref):
            k = pl.program_id(2)

            @pl.when(k == 0)
            def _():
                acc_ref[...] = jnp.zeros_like(acc_ref)

            acc_ref[...] += jnp.dot(x_ref[...], w_ref[...],
                                    preferred_element_type=jnp.float32)

            @pl.when(k == pl.num_programs(2) - 1)
            def _():
                o_ref[...] = _epilogue(acc_ref[...], b_ref[...]).astype(o_ref.dtype)

        return kernel

    def kernel(x_ref, w_ref, o_ref, acc_ref):
        k = pl.program_id(2)

        @pl.when(k == 0)
        def _():
            acc_ref[...] = jnp.zeros_like(acc_ref)

        acc_ref[...] += jnp.dot(x_ref[...], w_ref[...],
                                preferred_element_type=jnp.float32)

        @pl.when(k == pl.num_programs(2) - 1)
        def _():
            o_ref[...] = _epilogue(acc_ref[...]).astype(o_ref.dtype)

    return kernel


def fully_connected_forward(x, weight, bias=None, *, activation="relu",
                            lr_multiplier=1.0, tm=256, tn=256, tk=512,
                            compute_dtype=None):
    """out = activation(x @ (weight * weight_gain).T + bias * bias_gain)

    x:      [M, K]  float32
    weight: [N, K]  float32 (raw parameter, as stored in the module)
    bias:   [N]     float32 or None
    compute_dtype:  e.g. jnp.bfloat16 on v6e/v7x (f32 accumulation is kept).
    """
    M, K = x.shape
    N, K2 = weight.shape
    assert K == K2

    weight_gain = lr_multiplier / np.sqrt(K)
    bias_gain = lr_multiplier
    has_bias = bias is not None

    # One-time transpose to [K, N]; the gain is folded into the kernel epilogue
    # instead of being applied here (avoids a full-weight HBM read/write pass).
    w_t = jnp.transpose(weight)

    # Effective tiles: clamp to (padded) problem size, keep (8, 128) alignment.
    tm_eff = min(tm, _round_up(M, 8))
    tn_eff = min(tn, _round_up(N, 128))
    tk_eff = min(tk, _round_up(K, 128))

    Mp = _round_up(M, tm_eff)
    Np = _round_up(N, tn_eff)
    Kp = _round_up(K, tk_eff)

    x_p = x if (Mp, Kp) == (M, K) else jnp.pad(x, ((0, Mp - M), (0, Kp - K)))
    w_p = w_t if (Kp, Np) == (K, N) else jnp.pad(w_t, ((0, Kp - K), (0, Np - N)))

    if compute_dtype is not None:
        x_p = x_p.astype(compute_dtype)
        w_p = w_p.astype(compute_dtype)

    grid = (Mp // tm_eff, Np // tn_eff, Kp // tk_eff)

    in_specs = [
        pl.BlockSpec((tm_eff, tk_eff), lambda i, j, k: (i, k)),  # x tile
        pl.BlockSpec((tk_eff, tn_eff), lambda i, j, k: (k, j)),  # w[K,N] tile
    ]
    inputs = [x_p, w_p]
    bytes_accessed = x_p.size * x_p.dtype.itemsize + w_p.size * w_p.dtype.itemsize
    if has_bias:
        # Fold bias_gain into the (tiny) bias vector on the host.
        b = (bias.astype(jnp.float32) * jnp.float32(bias_gain)).reshape(1, N)
        if Np != N:
            b = jnp.pad(b, ((0, 0), (0, Np - N)))
        in_specs.append(pl.BlockSpec((1, tn_eff), lambda i, j, k: (0, j)))
        inputs.append(b)
        bytes_accessed += b.size * 4
    bytes_accessed += Mp * Np * jnp.dtype(x.dtype).itemsize

    kernel = _fc_kernel_factory(activation, weight_gain, has_bias)

    out = pl.pallas_call(
        kernel,
        out_shape=jax.ShapeDtypeStruct((Mp, Np), x.dtype),
        grid_spec=pltpu.PrefetchScalarGridSpec(
            num_scalar_prefetch=0,
            grid=grid,
            in_specs=in_specs,
            out_specs=pl.BlockSpec((tm_eff, tn_eff), lambda i, j, k: (i, j)),
            scratch_shapes=[pltpu.VMEM((tm_eff, tn_eff), jnp.float32)],
        ),
        compiler_params=pltpu.CompilerParams(
            dimension_semantics=("parallel", "parallel", "arbitrary"),
            vmem_limit_bytes=32 * 1024 * 1024,  # tiles are far below this on v5e/v6e/v7x
        ),
        cost_estimate=pl.CostEstimate(flops=2 * Mp * Np * Kp,
                                      transcendentals=0,
                                      bytes_accessed=int(bytes_accessed)),
    )(*inputs)

    if (Mp, Np) != (M, N):
        out = out[:M, :N]
    return out


if __name__ == "__main__":
    key = jax.random.PRNGKey(0)
    kx, kw, kb, ki = jax.random.split(key, 4)

    # --- literal spec: identity passthrough -------------------------------
    x_id = jax.random.normal(ki, (2, 4, 16, 16), dtype=jnp.float32)
    y_id = jax.block_until_ready(linear_forward(x_id))
    np.testing.assert_allclose(np.asarray(y_id), np.asarray(x_id))

    # --- FC forward: small, deliberately non-aligned shapes ---------------
    M, K, N = 200, 96, 160
    lr_multiplier = 1.0

    # Parameter init mirroring the module: weight = randn([out, in]) / lr_mult.
    weight = jax.random.normal(kw, (N, K), dtype=jnp.float32) / lr_multiplier
    bias = jax.random.normal(kb, (N,), dtype=jnp.float32)
    x = jax.random.normal(kx, (M, K), dtype=jnp.float32)

    # Bias + ReLU path.
    out = jax.block_until_ready(
        fully_connected_forward(x, weight, bias, activation="relu",
                                lr_multiplier=lr_multiplier))
    w_gain = lr_multiplier / np.sqrt(K)
    ref = jnp.maximum(x @ (weight * w_gain).T + bias * lr_multiplier, 0.0)
    np.testing.assert_allclose(np.asarray(out), np.asarray(ref),
                               rtol=1e-5, atol=1e-5)

    # No-bias, linear-activation path (bias DMA/add skipped entirely).
    out2 = jax.block_until_ready(
        fully_connected_forward(x, weight, None, activation="linear",
                                lr_multiplier=lr_multiplier))
    ref2 = x @ (weight * w_gain).T
    np.testing.assert_allclose(np.asarray(out2), np.asarray(ref2),
                               rtol=1e-5, atol=1e-5)

    print("KERNEL_OK")
</pallas_src>

<mosaic_0001>
module attributes {stable_mosaic.version = 11 : i64} {
  func.func @_identity_kernel(%arg0: memref<2x4x16x16xf32, #tpu.memory_space<vmem>>, %arg1: memref<2x4x16x16xf32, #tpu.memory_space<vmem>>) attributes {dimension_semantics = [], scalar_prefetch = 0 : i64, scratch_operands = 0 : i64, tpu.core_type = #tpu.core_type<tc>} {
    %c0 = arith.constant 0 : index
    %c0_0 = arith.constant 0 : index
    %c0_1 = arith.constant 0 : index
    %c0_2 = arith.constant 0 : index
    %0 = vector.load %arg0[%c0, %c0_0, %c0_1, %c0_2] : memref<2x4x16x16xf32, #tpu.memory_space<vmem>>, vector<2x4x16x16xf32>
    %c0_3 = arith.constant 0 : index
    %c0_4 = arith.constant 0 : index
    %c0_5 = arith.constant 0 : index
    %c0_6 = arith.constant 0 : index
    %1 = vector.load %arg1[%c0_3, %c0_4, %c0_5, %c0_6] : memref<2x4x16x16xf32, #tpu.memory_space<vmem>>, vector<2x4x16x16xf32>
    tpu.vector_store %arg1[%c0_3, %c0_4, %c0_5, %c0_6], %0 {strides = array<i32>} : memref<2x4x16x16xf32, #tpu.memory_space<vmem>>, vector<2x4x16x16xf32>,
    return
  }
}

</mosaic_0001>

<bundles_post_ra>
// kernel: tpu_custom_call.1
= control target key start
LH: loop header
LB: loop body
LE: loop exit
PB: predicated region body
PF: predicated region fallthrough
CT: control target
= control target key end

     0   :  { %6 = vsyncpa [#allocation3], 0  ;;  %s175_s0 = inlined_call_operand.hbm [shape: f32[2,4,16,16], index: 0, kind: input, shape index: {}]   ;;  %s176_s1 = inlined_call_operand.hbm [shape: f32[2,4,16,16], index: 1, kind: output, shape index: {}]  }
   0x1   :  { %7 = vsyncpa [#allocation4], 0  ;;  %s12_s8 = sshll.u32 %s175_s0, 4  ;;  %s133_s9 = smov [#allocation2]   ;;  %s13_s8 = int_to_ptr.hbm [resolvable:$true] %s12_s8 }
   0x2   :  { %s14_s10 = sshll.u32 %s133_s9, 4  ;;  %s134_s11 = smov 128   ;;  %s15_s10 = int_to_ptr.vmem [resolvable:$true] %s14_s10 }
   0x3   :  { %s135_s12 = smov 8  }
   0x4   :  { %20 = dma.hbm_to_vmem [thread:$0]  %s13_s8, 2048, %s15_s10, [#allocation3], %s134_s11, %s134_s11, %s135_s12  }
   0x5   :  { %129 = dma.done.wait [#allocation3], 2048  }
   0x6   :  { %130 = vsyncadd [#allocation3], 4294965248  ;;  %vm41_vm0 = vcmask 130048   ;;  %v25_v0 = vld [vmem:[#allocation2] sm:$0xff]  ;;  %v26_v1 = vld [vmem:[#allocation2 + $0x8] sm:$0xff]  ;;  %s136_s0 = smov [#allocation5]  }
   0x7   :  { %v27_v2 = vld [vmem:[#allocation2 + $0x10] sm:$0xff]  ;;  %42 = vst.msk [vmem:[#allocation5] sm:$0xff] %vm41_vm0, %v25_v0  ;;  %v28_v3 = vld [vmem:[#allocation2 + $0x18] sm:$0xff]  ;;  %v29_v4 = vld [vmem:[#allocation2 + $0x20] sm:$0xff]  ;;  %s62_s13 = sshll.u32 %s136_s0, 4  ;;  %s64_s16 = sshll.u32 %s176_s1, 4  ;;  %s63_s13 = int_to_ptr.vmem [resolvable:$true] %s62_s13  ;;  %s65_s16 = int_to_ptr.hbm [resolvable:$true] %s64_s16 }
   0x8   :  { %43 = vst.msk [vmem:[#allocation5 + $0x8] sm:$0xff] %vm41_vm0, %v26_v1  ;;  %v30_v5 = vld [vmem:[#allocation2 + $0x28] sm:$0xff]  ;;  %v31_v6 = vld [vmem:[#allocation2 + $0x30] sm:$0xff]  ;;  %v32_v7 = vld [vmem:[#allocation2 + $0x38] sm:$0xff] }
   0x9   :  { %44 = vst.msk [vmem:[#allocation5 + $0x10] sm:$0xff] %vm41_vm0, %v27_v2  ;;  %v33_v8 = vld [vmem:[#allocation2 + $0x40] sm:$0xff]  ;;  %v34_v9 = vld [vmem:[#allocation2 + $0x48] sm:$0xff]  ;;  %v35_v10 = vld [vmem:[#allocation2 + $0x50] sm:$0xff] }
   0xa   :  { %45 = vst.msk [vmem:[#allocation5 + $0x18] sm:$0xff] %vm41_vm0, %v28_v3  ;;  %v36_v11 = vld [vmem:[#allocation2 + $0x58] sm:$0xff]  ;;  %v37_v12 = vld [vmem:[#allocation2 + $0x60] sm:$0xff]  ;;  %v38_v13 = vld [vmem:[#allocation2 + $0x68] sm:$0xff] }
   0xb   :  { %46 = vst.msk [vmem:[#allocation5 + $0x20] sm:$0xff] %vm41_vm0, %v29_v4  ;;  %v39_v14 = vld [vmem:[#allocation2 + $0x70] sm:$0xff]  ;;  %v40_v15 = vld [vmem:[#allocation2 + $0x78] sm:$0xff] }
   0xc   :  { %47 = vst.msk [vmem:[#allocation5 + $0x28] sm:$0xff] %vm41_vm0, %v30_v5 }
   0xd   :  { %48 = vst.msk [vmem:[#allocation5 + $0x30] sm:$0xff] %vm41_vm0, %v31_v6 }
   0xe   :  { %49 = vst.msk [vmem:[#allocation5 + $0x38] sm:$0xff] %vm41_vm0, %v32_v7 }
   0xf   :  { %50 = vst.msk [vmem:[#allocation5 + $0x40] sm:$0xff] %vm41_vm0, %v33_v8 }
  0x10   :  { %51 = vst.msk [vmem:[#allocation5 + $0x48] sm:$0xff] %vm41_vm0, %v34_v9 }
  0x11   :  { %52 = vst.msk [vmem:[#allocation5 + $0x50] sm:$0xff] %vm41_vm0, %v35_v10 }
  0x12   :  { %53 = vst.msk [vmem:[#allocation5 + $0x58] sm:$0xff] %vm41_vm0, %v36_v11 }
  0x13   :  { %54 = vst.msk [vmem:[#allocation5 + $0x60] sm:$0xff] %vm41_vm0, %v37_v12 }
  0x14   :  { %55 = vst.msk [vmem:[#allocation5 + $0x68] sm:$0xff] %vm41_vm0, %v38_v13 }
  0x15   :  { %56 = vst.msk [vmem:[#allocation5 + $0x70] sm:$0xff] %vm41_vm0, %v39_v14 }
  0x16   :  { %57 = vst.msk [vmem:[#allocation5 + $0x78] sm:$0xff] %vm41_vm0, %v40_v15 }
  0x17   :  { %70 = dma.vmem_to_hbm [thread:$0]  %s63_s13, 2048, %s65_s16, [#allocation4], %s134_s11, %s134_s11, %s135_s12  }
  0x18   :  { %131 = dma.done.wait [#allocation4], 2048  }
  0x19   :  { %132 = vsyncadd [#allocation4], 4294965248 }
  0x1a   :  { %75 = vsyncpa [#allocation3], 1 }
  0x1b   :  { %76 = vsyncpa [#allocation4], 1 }

</bundles_post_ra>
